<compile_context>
chip_gen: v6e
topology: v6e:2x2x1
jax: 0.10.0
libtpu: 0.0.40
codegen_flags: <defaults>
</compile_context>

<pallas_src>
import functools

import jax
import jax.numpy as jnp
from jax.experimental import pallas as pl
from jax.experimental.pallas import tpu as pltpu


# ---------------------------------------------------------------------------
# Kernels
# ---------------------------------------------------------------------------

def _conv1x1_bn_kernel(x_ref, w_ref, scale_ref, shift_ref, o_ref):
    """stride == 1 path.

    x_ref:     (nb, Cin, t_pix)  nb batch rows x one lane-dense pixel tile
    w_ref:     (Cout, Cin)       UN-scaled conv weight, compute dtype
    scale_ref: (Cout, 1) f32     BN scale, applied in the f32 epilogue
    shift_ref: (Cout, 1) f32     BN shift
    o_ref:     (nb, Cout, t_pix)
    """
    w = w_ref[...]
    scale = scale_ref[...]
    shift = shift_ref[...]
    for b in range(x_ref.shape[0]):          # static unroll; nb <= 8
        acc = jnp.dot(w, x_ref[b], preferred_element_type=jnp.float32)
        o_ref[b] = (acc * scale + shift).astype(o_ref.dtype)


def _conv1x1_bn_stride_kernel(x_ref, w_ref, sel_ref, scale_ref, shift_ref, o_ref):
    """stride > 1 path: in-kernel spatial subsampling (no HBM pre-pass).

    x_ref:     (Cin, t_h, stride*W)  t_h output rows; each row packs the output
                                     row and its skipped neighbours, full width
    w_ref:     (Cout, Cin)
    sel_ref:   (stride*W, Wo)        exact 0/1 column-selection matrix
    scale_ref: (Cout, 1) f32
    shift_ref: (Cout, 1) f32
    o_ref:     (Cout, t_h, Wo)
    """
    w = w_ref[...]
    sel = sel_ref[...]
    scale = scale_ref[...]
    shift = shift_ref[...]
    for r in range(o_ref.shape[1]):          # static unroll; t_h <= 32
        row = x_ref[:, r, :]                               # (Cin, stride*W)
        sub = jnp.dot(row, sel)                            # exact column pick (MXU)
        acc = jnp.dot(w, sub, preferred_element_type=jnp.float32)
        o_ref[:, r, :] = (acc * scale + shift).astype(o_ref.dtype)


# ---------------------------------------------------------------------------
# Helpers
# ---------------------------------------------------------------------------

def _vmem_capacity_bytes():
    """Physical per-core VMEM; conservative 64 MiB (v7x) fallback."""
    try:
        return int(pltpu.get_tpu_info().vmem_capacity_bytes)
    except Exception:
        return 64 << 20


def _spec(shape, index_map, *, buffer_count=None):
    """BlockSpec, optionally with a non-default pipeline buffer count."""
    if buffer_count is not None and hasattr(pl, "Buffered"):
        try:
            return pl.BlockSpec(shape, index_map,
                                pipeline_mode=pl.Buffered(buffer_count))
        except TypeError:
            pass
    return pl.BlockSpec(shape, index_map)


def _pick_flat_tiles(n, hw, cin, cout, x_bytes, o_bytes, budget, requested):
    """(nb, t_pix) for the stride==1 path.

    t_pix: lane tile, multiple of 128 (or full hw), targeting ~2 MiB of x per
    step; nb: batch elements folded per step when hw is tiny.  Both are shrunk
    (nb first, then t_pix in 128-lane steps) until the double-buffered
    footprint fits the VMEM budget, and the grid is kept at >= 2 steps.
    """
    if requested is None:
        t_pix = (2 << 20) // max(1, cin * x_bytes)
        t_pix = max(512, min(int(t_pix), 8192))
    else:
        t_pix = max(128, min(int(requested), 65536))
    t_pix = (t_pix // 128) * 128
    if hw <= t_pix:
        t_pix = hw                        # full extent: legal for any hw

    nb = 1
    if t_pix == hw and hw < 512 and n > 1:
        nb = min(n, 8, max(1, 1024 // max(1, hw)))

    w_bytes_tot = cout * cin * x_bytes
    w_foot = w_bytes_tot if w_bytes_tot > (2 << 20) else 2 * w_bytes_tot

    def footprint(nb_, tp_):
        return (2 * nb_ * cin * tp_ * x_bytes        # double-buffered x tiles
                + 2 * nb_ * cout * tp_ * o_bytes     # double-buffered out tiles
                + w_foot                             # weight
                + 4 * cout * 4 + 4096)               # scale/shift + slack

    while nb > 1 and footprint(nb, t_pix) > budget:
        nb -= 1
    if footprint(nb, t_pix) > budget and t_pix == hw and hw > 128:
        t_pix = max(128, (hw // 128) * 128)
    while t_pix > 128 and footprint(nb, t_pix) > budget:
        t_pix -= 128

    # Keep >= 2 grid steps so both v7x TensorCores have work.
    steps = -(-n // nb) * -(-hw // t_pix)
    if steps < 2:
        if nb > 1:
            nb = min(nb, max(1, (n + 1) // 2))
        elif n == 1 and t_pix >= hw and hw >= 256:
            t_pix = max(128, ((-(-hw // 2) + 127) // 128) * 128)
    return nb, t_pix


def _pick_row_tiles(ho, cin, cout, sw, wo, x_bytes, o_bytes, budget):
    """Row tile for the stride>1 path (~2 MiB of x per step, <=32 rows)."""
    t_h = (2 << 20) // max(1, cin * sw * x_bytes)
    t_h = max(1, min(int(t_h), ho, 32))
    if t_h < ho:
        t_h = min(ho, max(8, (t_h // 8) * 8))

    def footprint(th_):
        return (2 * cin * th_ * sw * x_bytes
                + 2 * cout * th_ * wo * o_bytes
                + 2 * cout * cin * x_bytes + 2 * sw * wo * x_bytes
                + 4 * cout * 4 + 4096)

    while t_h > 8 and footprint(t_h) > budget:
        t_h -= 8
    return t_h


# ---------------------------------------------------------------------------
# Wrapper
# ---------------------------------------------------------------------------

def _run_strided(x, w_mat, scale, shift, *, stride, out_dtype, budget, vmem_limit):
    n, cin, h, w = x.shape
    cout = w_mat.shape[0]
    ho = h // stride
    wo = -(-w // stride)              # ceil(W/stride): matches 1x1/stride conv
    sw = stride * w

    # Pure-view reshape: row r of the (Ho, stride*W) view starts at input row
    # r*stride; the strided columns of its first W entries are the output row.
    x_rows = x.reshape(n, cin, ho, sw)

    # Exact 0/1 selection matrix: the strided column pick runs on the MXU,
    # avoiding a wrapper-side strided HBM copy of the whole input.
    sel = (jnp.arange(sw)[:, None] == (jnp.arange(wo) * stride)[None, :]).astype(x.dtype)

    x_bytes = jnp.dtype(x.dtype).itemsize
    o_bytes = jnp.dtype(out_dtype).itemsize
    t_h = _pick_row_tiles(ho, cin, cout, sw, wo, x_bytes, o_bytes, budget)
    grid = (n, pl.cdiv(ho, t_h))

    w_spec = _spec((cout, cin), lambda b, j: (0, 0),
                   buffer_count=1 if cout * cin * x_bytes > (2 << 20) else None)

    cost = pl.CostEstimate(
        flops=2 * n * cout * cin * ho * wo + 2 * n * cin * ho * sw * wo,
        transcendentals=0,
        bytes_accessed=(n * cin * h * w * x_bytes + cout * cin * x_bytes
                        + n * cout * ho * wo * o_bytes))

    return pl.pallas_call(
        _conv1x1_bn_stride_kernel,
        out_shape=jax.ShapeDtypeStruct((n, cout, ho, wo), out_dtype),
        grid_spec=pltpu.PrefetchScalarGridSpec(
            num_scalar_prefetch=0,
            grid=grid,
            in_specs=[
                pl.BlockSpec((None, cin, t_h, sw), lambda b, j: (b, 0, j, 0)),
                w_spec,
                pl.BlockSpec((sw, wo), lambda b, j: (0, 0)),
                pl.BlockSpec((cout, 1), lambda b, j: (0, 0)),
                pl.BlockSpec((cout, 1), lambda b, j: (0, 0)),
            ],
            out_specs=pl.BlockSpec((None, cout, t_h, wo),
                                   lambda b, j: (b, 0, j, 0)),
        ),
        compiler_params=pltpu.CompilerParams(
            dimension_semantics=("parallel", "parallel"),
            vmem_limit_bytes=int(vmem_limit)),
        cost_estimate=cost,
    )(x_rows, w_mat, sel, scale, shift)


def conv1x1_linear(x_nchw, conv_w, gamma, beta, running_mean, running_var,
                   *, stride=1, eps=1e-5, pixel_tile=None, compute_dtype=None,
                   out_dtype=None):
    """Pallas implementation of Conv1x1Linear.forward (eval-mode BatchNorm).

    x_nchw: (N, Cin, H, W); conv_w: (Cout, Cin, 1, 1) (PyTorch layout).
    """
    n, cin, h, w = x_nchw.shape
    cout = conv_w.shape[0]

    if out_dtype is None:
        out_dtype = compute_dtype if compute_dtype is not None else x_nchw.dtype
    out_dtype = jnp.dtype(out_dtype)

    # Fold BN (inference mode).  The scale is NOT folded into the weight:
    # keeping the weight exact in the compute dtype and applying the f32
    # scale in the epilogue preserves bf16 accuracy.
    scale = (gamma.astype(jnp.float32)
             / jnp.sqrt(running_var.astype(jnp.float32) + eps)).reshape(cout, 1)
    shift = (beta.astype(jnp.float32).reshape(cout, 1)
             - running_mean.astype(jnp.float32).reshape(cout, 1) * scale)

    x_dtype = jnp.dtype(compute_dtype) if compute_dtype is not None else x_nchw.dtype
    x_cast = x_nchw.astype(x_dtype)
    w_mat = conv_w.reshape(cout, cin).astype(x_dtype)

    x_bytes = jnp.dtype(x_dtype).itemsize
    o_bytes = out_dtype.itemsize

    capacity = _vmem_capacity_bytes()
    budget = (capacity * 13) // 20        # ~65%: tile-selection budget
    vmem_limit = (capacity * 4) // 5      # ~80%: declared scoped-VMEM limit

    if stride > 1 and h % stride == 0:
        return _run_strided(x_cast, w_mat, scale, shift, stride=stride,
                            out_dtype=out_dtype, budget=budget,
                            vmem_limit=vmem_limit)

    if stride > 1:
        # Rare ragged case (H % stride != 0): wrapper-side subsample.
        # TODO(synk): cover this case in-kernel as well.
        x_cast = x_cast[:, :, ::stride, ::stride]

    n, cin, ho, wo = x_cast.shape
    hw = ho * wo
    x_flat = x_cast.reshape(n, cin, hw)   # pixels on the lane axis (pure view)

    nb, t_pix = _pick_flat_tiles(n, hw, cin, cout, x_bytes, o_bytes, budget,
                                 pixel_tile)
    grid = (pl.cdiv(n, nb), pl.cdiv(hw, t_pix))

    w_spec = _spec((cout, cin), lambda b, j: (0, 0),
                   buffer_count=1 if cout * cin * x_bytes > (2 << 20) else None)

    cost = pl.CostEstimate(
        flops=2 * n * cout * cin * hw,
        transcendentals=0,
        bytes_accessed=(n * cin * hw * x_bytes + cout * cin * x_bytes
                        + n * cout * hw * o_bytes))

    out = pl.pallas_call(
        _conv1x1_bn_kernel,
        out_shape=jax.ShapeDtypeStruct((n, cout, hw), out_dtype),
        grid_spec=pltpu.PrefetchScalarGridSpec(
            num_scalar_prefetch=0,
            grid=grid,
            in_specs=[
                pl.BlockSpec((nb, cin, t_pix), lambda b, j: (b, 0, j)),
                w_spec,
                pl.BlockSpec((cout, 1), lambda b, j: (0, 0)),
                pl.BlockSpec((cout, 1), lambda b, j: (0, 0)),
            ],
            out_specs=pl.BlockSpec((nb, cout, t_pix), lambda b, j: (b, 0, j)),
        ),
        compiler_params=pltpu.CompilerParams(
            dimension_semantics=("parallel", "parallel"),
            vmem_limit_bytes=int(vmem_limit)),
        cost_estimate=cost,
    )(x_flat, w_mat, scale, shift)

    # (N, Cout, H'*W') -> NCHW: pure view reshape (no transpose).
    return out.reshape(n, cout, ho, wo)


# ---------------------------------------------------------------------------
# Reference + tests
# ---------------------------------------------------------------------------

def _reference(x_nchw, conv_w, gamma, beta, running_mean, running_var,
               *, stride=1, eps=1e-5):
    xs = x_nchw[:, :, ::stride, ::stride]
    y = jnp.einsum('nchw,oc->nohw', xs,
                   conv_w.reshape(conv_w.shape[0], conv_w.shape[1]))
    scale = gamma / jnp.sqrt(running_var + eps)
    shift = beta - running_mean * scale
    return y * scale[None, :, None, None] + shift[None, :, None, None]


if __name__ == "__main__":
    key = jax.random.PRNGKey(0)
    k1, k2, k3, k4, k5, k6 = jax.random.split(key, 6)

    batch, in_channels, out_channels, spatial = 2, 4, 8, 16

    x = jax.random.normal(k1, (batch, in_channels, spatial, spatial),
                          dtype=jnp.float32)
    conv_w = jax.random.normal(k2, (out_channels, in_channels, 1, 1),
                               dtype=jnp.float32) * 0.1
    gamma = jax.random.normal(k3, (out_channels,), dtype=jnp.float32) * 0.1 + 1.0
    beta = jax.random.normal(k4, (out_channels,), dtype=jnp.float32) * 0.1
    running_mean = jax.random.normal(k5, (out_channels,), dtype=jnp.float32) * 0.05
    running_var = jnp.abs(jax.random.normal(k6, (out_channels,),
                                            dtype=jnp.float32)) * 0.1 + 1.0

    # 1) stride=1, f32
    fn = jax.jit(functools.partial(conv1x1_linear, stride=1))
    out = jax.block_until_ready(
        fn(x, conv_w, gamma, beta, running_mean, running_var))
    ref = _reference(x, conv_w, gamma, beta, running_mean, running_var, stride=1)
    assert out.shape == ref.shape, (out.shape, ref.shape)
    assert jnp.allclose(out, ref, atol=1e-4, rtol=1e-4), "stride=1 f32 mismatch"

    # 2) stride=2, f32 (in-kernel subsampling path, no HBM pre-pass)
    fn2 = jax.jit(functools.partial(conv1x1_linear, stride=2))
    out2 = jax.block_until_ready(
        fn2(x, conv_w, gamma, beta, running_mean, running_var))
    ref2 = _reference(x, conv_w, gamma, beta, running_mean, running_var, stride=2)
    assert out2.shape == ref2.shape, (out2.shape, ref2.shape)
    assert jnp.allclose(out2, ref2, atol=1e-4, rtol=1e-4), "stride=2 f32 mismatch"

    # 3) stride=2 with odd spatial size (ragged fallback + small-hw path)
    x_odd = x[:, :, :15, :15]
    out3 = jax.block_until_ready(
        jax.jit(functools.partial(conv1x1_linear, stride=2))(
            x_odd, conv_w, gamma, beta, running_mean, running_var))
    ref3 = _reference(x_odd, conv_w, gamma, beta, running_mean, running_var,
                      stride=2)
    assert out3.shape == ref3.shape, (out3.shape, ref3.shape)
    assert jnp.allclose(out3, ref3, atol=1e-4, rtol=1e-4), "stride=2 ragged mismatch"

    # 4) bf16 compute + bf16 output (halves HBM traffic); f32 scale epilogue.
    fn_bf16 = jax.jit(functools.partial(conv1x1_linear, stride=1,
                                        compute_dtype=jnp.bfloat16))
    out_bf = jax.block_until_ready(
        fn_bf16(x, conv_w, gamma, beta, running_mean, running_var))
    assert out_bf.shape == ref.shape
    assert out_bf.dtype == jnp.bfloat16
    assert jnp.allclose(out_bf.astype(jnp.float32), ref,
                        atol=5e-2, rtol=5e-2), "bf16 path mismatch"

    print("KERNEL_OK")
</pallas_src>

<mosaic_0001>
module attributes {stable_mosaic.version = 11 : i64} {
  func.func @_conv1x1_bn_kernel(%arg0: i32, %arg1: i32, %arg2: memref<1x4x256xf32, #tpu.memory_space<vmem>>, %arg3: memref<8x4xf32, #tpu.memory_space<vmem>>, %arg4: memref<8x1xf32, #tpu.memory_space<vmem>>, %arg5: memref<8x1xf32, #tpu.memory_space<vmem>>, %arg6: memref<1x8x256xf32, #tpu.memory_space<vmem>>) attributes {dimension_semantics = [#tpu.dimension_semantics<parallel>, #tpu.dimension_semantics<parallel>], iteration_bounds = array<i64: 2, 1>, scalar_prefetch = 0 : i64, scratch_operands = 0 : i64, tpu.core_type = #tpu.core_type<tc>, window_params = [{transform_indices = @transform_0, window_bounds = array<i64: 1, 4, 256>}, {pipeline_mode = #tpu.pipeline_mode<synchronous>, transform_indices = @transform_1, window_bounds = array<i64: 8, 4>}, {pipeline_mode = #tpu.pipeline_mode<synchronous>, transform_indices = @transform_2, window_bounds = array<i64: 8, 1>}, {pipeline_mode = #tpu.pipeline_mode<synchronous>, transform_indices = @transform_3, window_bounds = array<i64: 8, 1>}, {transform_indices = @transform_4, window_bounds = array<i64: 1, 8, 256>}]} {
    %c0 = arith.constant 0 : index
    %c0_0 = arith.constant 0 : index
    %0 = vector.load %arg3[%c0, %c0_0] : memref<8x4xf32, #tpu.memory_space<vmem>>, vector<8x4xf32>
    %c0_1 = arith.constant 0 : index
    %c0_2 = arith.constant 0 : index
    %1 = vector.load %arg4[%c0_1, %c0_2] : memref<8x1xf32, #tpu.memory_space<vmem>>, vector<8x1xf32>
    %c0_3 = arith.constant 0 : index
    %c0_4 = arith.constant 0 : index
    %2 = vector.load %arg5[%c0_3, %c0_4] : memref<8x1xf32, #tpu.memory_space<vmem>>, vector<8x1xf32>
    %c0_5 = arith.constant 0 : index
    %c0_6 = arith.constant 0 : index
    %c0_7 = arith.constant 0 : index
    %3 = vector.load %arg2[%c0_5, %c0_6, %c0_7] : memref<1x4x256xf32, #tpu.memory_space<vmem>>, vector<1x4x256xf32>
    %4 = vector.shape_cast %3 : vector<1x4x256xf32> to vector<4x256xf32>
    %cst = arith.constant dense<0.000000e+00> : vector<8x256xf32>
    %5 = tpu.matmul %0, %4, %cst {dimension_numbers = #tpu.dot_dimension_numbers<[1], [0], [0], [1], [0, 0, 1, 1], [], []>} : vector<8x4xf32>, vector<4x256xf32>, vector<8x256xf32> -> vector<8x256xf32>
    %6 = vector.broadcast %1 : vector<8x1xf32> to vector<8x256xf32>
    %7 = arith.mulf %5, %6 : vector<8x256xf32>
    %8 = vector.broadcast %2 : vector<8x1xf32> to vector<8x256xf32>
    %9 = arith.addf %7, %8 : vector<8x256xf32>
    %c0_8 = arith.constant 0 : index
    %c0_9 = arith.constant 0 : index
    %c0_10 = arith.constant 0 : index
    %10 = vector.load %arg6[%c0_8, %c0_9, %c0_10] : memref<1x8x256xf32, #tpu.memory_space<vmem>>, vector<1x8x256xf32>
    %11 = vector.shape_cast %10 : vector<1x8x256xf32> to vector<8x256xf32>
    %12 = vector.shape_cast %9 : vector<8x256xf32> to vector<1x8x256xf32>
    tpu.vector_store %arg6[%c0_8, %c0_9, %c0_10], %12 {strides = array<i32>} : memref<1x8x256xf32, #tpu.memory_space<vmem>>, vector<1x8x256xf32>,
    return
  }
  func.func @transform_0(%arg0: i32, %arg1: i32) -> (i32, i32, i32) {
    %c0_i32 = arith.constant 0 : i32
    %c0_i32_0 = arith.constant 0 : i32
    return %arg0, %c0_i32, %arg1 : i32, i32, i32
  }
  func.func @transform_1(%arg0: i32, %arg1: i32) -> (i32, i32) {
    %c0_i32 = arith.constant 0 : i32
    %c0_i32_0 = arith.constant 0 : i32
    %c0_i32_1 = arith.constant 0 : i32
    return %c0_i32, %c0_i32_0 : i32, i32
  }
  func.func @transform_2(%arg0: i32, %arg1: i32) -> (i32, i32) {
    %c0_i32 = arith.constant 0 : i32
    %c0_i32_0 = arith.constant 0 : i32
    %c0_i32_1 = arith.constant 0 : i32
    return %c0_i32, %c0_i32_0 : i32, i32
  }
  func.func @transform_3(%arg0: i32, %arg1: i32) -> (i32, i32) {
    %c0_i32 = arith.constant 0 : i32
    %c0_i32_0 = arith.constant 0 : i32
    %c0_i32_1 = arith.constant 0 : i32
    return %c0_i32, %c0_i32_0 : i32, i32
  }
  func.func @transform_4(%arg0: i32, %arg1: i32) -> (i32, i32, i32) {
    %c0_i32 = arith.constant 0 : i32
    %c0_i32_0 = arith.constant 0 : i32
    return %arg0, %c0_i32, %arg1 : i32, i32, i32
  }
}

</mosaic_0001>

<bundles_post_ra>
// kernel: conv1x1_linear.1
= control target key start
LH: loop header
LB: loop body
LE: loop exit
PB: predicated region body
PF: predicated region fallthrough
CT: control target
= control target key end

     0   :  { %s521_s15 = smov 0   ;;  %s523_s16 = smov 0   ;;  %s563_s0 = inlined_call_operand.vmem [shape: f32[2,4,256], index: 0, kind: input, shape index: {}]   ;;  %s564_s1 = inlined_call_operand.vmem [shape: f32[8,4], index: 1, kind: input, shape index: {}]   ;;  %s565_s2 = inlined_call_operand.vmem [shape: f32[8,1], index: 2, kind: input, shape index: {}]   ;;  %s566_s3 = inlined_call_operand.vmem [shape: f32[8,1], index: 3, kind: input, shape index: {}]   ;;  %s567_s4 = inlined_call_operand.vmem [shape: f32[2,8,256], index: 4, kind: output, shape index: {}]  }
   0x1   :  { %s525_s17 = smov 0  }
   0x2 LB: > { %s26_s18 = sadd.s32 1, %s488_s16  ;;  %p430_p0 = scmp.ge.s32.totalorder %s492_s17, 1  ;;  %s492_s17 = sphi %s525_s17, %s14_s17   ;;  %s488_s16 = sphi %s523_s16, %s569_s16   ;;  %s484_s15 = sphi %s521_s15, %s568_s15  }
   0x3   : > { %p28_p1 = scmp.ge.s32.totalorder %s26_s18, 2  ;;  %p183_p2 = scmp.lt.s32.totalorder %s492_s17, 3 }
   0x5   : > { %s571_s18 = smov (%p28_p1, %s26_s18), 0  ;;  %p184_p3 = pnand %p430_p0, %p183_p2 }
   0x6   : > { %p218_p4 = scmp.lt.s32.totalorder (!%p184_p3), %s484_s15, 1 }
   0x7   : > { %187 = sbr.rel (%p184_p3) target bundleno = 220 (0xdc), region = 36 }
   0xc   : > { %v494_v0 = vmov 0.0   ;;  %v495_v1 = vmov 0   ;;  %v238_v2 = vld [vmem:[%s565_s2] sm:$0xff]  ;;  %s573_s15 = smov (!%p218_p4, %s484_s15), 1  ;;  %vm247_vm0 = vcmask 1043456   ;;  %vm243_vm1 = vcmask 31744  }
   0xd   : > { %316 = vmatprep.mubr.f32.mxu0 %v494_v0  ;;  %468 = vset.pattern.permute.xlu0 %v495_v1  ;;  %v239_v3 = vld [vmem:[%s566_s3] sm:$0xff]  ;;  %s440_s23 = sshll.u32 %s573_s15, 3  ;;  %s441_s29 = sshll.u32 %s573_s15, 4 }
   0xe   : > { %325 = vperm.xlu0 %468, %v238_v2   ;;  %s225_s26 = scalar_lea.vmem %s563_s0, %s440_s23  ;;  %v237_v6 = vld [vmem:[%s564_s1] sm:$0xff]  ;;  %s235_s6 = scalar_lea.vmem %s567_s4, %s441_s29 }
   0xf   : > { %v240_v4 = vld [vmem:[%s225_s26] sm:$0xff] }
  0x10   : > { %v242_v5 = vcombine.high %v240_v4, %v240_v4 }
  0x12   : > { %332 = vperm.xlu0 %468, %v239_v3   ;;  %435 = vmatprep.subr.msk.mxu0 %vm247_vm0, %v242_v5 }
  0x13   : > { %436 = vmatpush1.msk.msra.mxu0 %vm247_vm0, %v240_v4 }
  0x14   : > { %437 = vmatmul.mubr.msk.f32.vlgmr.msra.gmra.mxu0 %vm243_vm1, %v237_v6 }
  0x89   : > { %v326_v7 = vpop.permute.xlu0 %325 }
  0x8d   : > { %v333_v10 = vpop.permute.xlu0 %332 }
  0xd4   : > { %v318_v8 = vpop.f32.mrf.mxu0 }
  0xd5   : > { %v328_v9 = vmul.f32 %v326_v7, %v318_v8 }
  0xd6   : > { %v320_v11 = vpop.f32.mrf.mxu0 }
  0xd7   : > { %v335_v12 = vadd.f32 %v333_v10, %v328_v9  ;;  %v329_v13 = vmul.f32 %v326_v7, %v320_v11 }
  0xd9   : > { %337 = vst [vmem:[%s235_s6] sm:$0xff] %v335_v12  ;;  %v336_v14 = vadd.f32 %v333_v10, %v329_v13 }
  0xdb   : > { %338 = vst [vmem:[%s235_s6 + $0x8] sm:$0xff] %v336_v14 }
  0xdc PF: > { %s14_s17 = sadd.s32 1, %s492_s17   ;;  %s568_s15 = smov %s488_s16 }
  0xdd   : > { %p11_p5 = scmp.ge.s32.totalorder %s14_s17, 4   ;;  %s569_s16 = smov %s571_s18 }
  0xdf   :  { %13 = sbr.rel (!%p11_p5) target bundleno = 2 (0x2), region = 66 }

</bundles_post_ra>
